<compile_context>
chip_gen: v6e
topology: v6e:2x2x1
jax: 0.10.0
libtpu: 0.0.40
codegen_flags: <defaults>
</compile_context>

<pallas_src>
import jax
import jax.numpy as jnp
from jax.experimental import pallas as pl
from jax.experimental.pallas import tpu as pltpu

_LANE = 128
_ABS_MAX_TILE_COLS = 4096               # diminishing HBM-roofline returns beyond this
_TARGET_BLOCK_BYTES = 2 * 1024 * 1024   # ~2 MiB input blocks amortize per-step overhead
_VMEM_HEADROOM = 4 * 1024 * 1024        # internal scratch / compiler slack


def _round_up(v, m):
    return ((v + m - 1) // m) * m


def _round_down(v, m):
    return (v // m) * m


def _vmem_capacity_bytes():
    try:
        return int(pltpu.get_tpu_info().vmem_capacity_bytes)
    except Exception:
        return 64 * 1024 * 1024         # conservative fallback (v7x per-TC physical)


def _plan(N, C, C_out, HW, x_it, o_it, w_it):
    """Pick (Bn, tile_cols, tile_cout, vmem_limit) from a per-generation VMEM budget."""
    cap = _vmem_capacity_bytes()
    budget = int(0.6 * cap)

    # C_out tiling: keep the double-buffered resident weight to <= ~25% of budget.
    w_db = 2 * C * C_out * w_it
    if w_db > budget // 4 and C_out > 256:
        tile_cout = max(256, _round_down((budget // 4) // (2 * C * w_it), 256))
        tile_cout = min(tile_cout, C_out)
    else:
        tile_cout = C_out
    w_db = 2 * C * tile_cout * w_it

    # Column tile: largest lane-dense tile under the remaining budget (no divisor search).
    per_col = 2 * (C * x_it + tile_cout * o_it)           # double-buffered x + out
    col_budget = max(budget - w_db, per_col * _LANE)
    max_cols = max(_LANE, _round_down(col_budget // per_col, _LANE))
    max_cols = min(max_cols, _ABS_MAX_TILE_COLS)
    if HW <= max_cols:
        tile_cols = HW                                     # full-dim block: always legal
    else:
        tile_cols = max_cols                               # multiple of 128; tail masked

    # Batch blocking: amortize per-step overhead when feature maps are small.
    Bn = 1
    x_block_bytes = C * tile_cols * x_it
    if tile_cols == HW and N > 1 and x_block_bytes < _TARGET_BLOCK_BYTES:
        want = _TARGET_BLOCK_BYTES // max(x_block_bytes, 1)
        want = max(1, min(want, N // 2, 64))               # keep >=2 batch blocks
        for cand in range(int(want), 0, -1):
            if N % cand == 0 and cand * per_col * tile_cols <= col_budget:
                Bn = cand
                break

    # Guarantee >= 2 parallel grid steps for v7x's two TensorCores.
    n_blocks = N // Bn
    hw_blocks = pl.cdiv(HW, tile_cols)
    co_blocks = pl.cdiv(C_out, tile_cout)
    if n_blocks * hw_blocks * co_blocks < 2 and HW > _LANE:
        half = _round_up(pl.cdiv(HW, 2), _LANE)
        if half < HW:                                      # multiple of 128, < HW: legal
            tile_cols = half

    # Explicit scoped-VMEM limit sized to the chosen blocks (+ headroom).
    need = (2 * Bn * tile_cols * (C * x_it + tile_cout * o_it)
            + 2 * C * tile_cout * w_it + _VMEM_HEADROOM)
    vmem_limit = int(min(cap, max(need, 16 * 1024 * 1024)))

    return Bn, tile_cols, tile_cout, vmem_limit


def _fused_residual_kernel(x_ref, w_ref, o_ref):
    # x_ref: (Bn, C_in, Tc)   w_ref: (Tco, C_in)   o_ref: (Bn, Tco, Tc)
    # out = relu(W_eff @ x); W_eff already folds the downsample / identity skip.
    w = w_ref[...]
    for b in range(x_ref.shape[0]):                        # static unroll, Bn is small
        acc = jnp.dot(w, x_ref[b], preferred_element_type=jnp.float32)
        o_ref[b] = jnp.maximum(acc, 0.0).astype(o_ref.dtype)


def residual_forward(x_nchw, w_module, w_downsample=None, compute_dtype=None):
    """Residual.forward with module/downsample = bias-free 1x1 convs.

    x_nchw:        (N, C_in, H, W)
    w_module:      (C_out, C_in)  (PyTorch Conv2d weight (C_out, C_in, 1, 1) squeezed)
    w_downsample:  (C_out, C_in) or None (identity skip; requires C_in == C_out)
    compute_dtype: optional (e.g. jnp.bfloat16) to halve HBM traffic on v5e.
    returns:       (N, C_out, H, W)
    """
    N, C, H, W = x_nchw.shape
    C_out = w_module.shape[0]
    HW = H * W
    out_dtype = x_nchw.dtype

    # Fold the skip path into the weight (rounding-order change covered by tolerances).
    wm = w_module.astype(jnp.float32)
    if w_downsample is not None:
        w_eff = wm + w_downsample.astype(jnp.float32)
    else:
        assert C == C_out, "identity skip requires C_in == C_out"
        w_eff = wm + jnp.eye(C, dtype=jnp.float32)
    w_eff = w_eff.astype(compute_dtype if compute_dtype is not None else w_module.dtype)

    x_rows = x_nchw.reshape(N, C, HW)                      # pure view, no data movement
    if compute_dtype is not None:
        x_rows = x_rows.astype(compute_dtype)

    x_it = jnp.dtype(x_rows.dtype).itemsize
    o_it = jnp.dtype(out_dtype).itemsize
    w_it = jnp.dtype(w_eff.dtype).itemsize
    Bn, tile_cols, tile_cout, vmem_limit = _plan(N, C, C_out, HW, x_it, o_it, w_it)

    grid = (N // Bn, pl.cdiv(HW, tile_cols), pl.cdiv(C_out, tile_cout))

    cost = pl.CostEstimate(
        flops=2 * N * HW * C * C_out,
        transcendentals=0,
        bytes_accessed=int(N * HW * (C * x_it + C_out * o_it) + C * C_out * w_it),
    )

    out_rows = pl.pallas_call(
        _fused_residual_kernel,
        out_shape=jax.ShapeDtypeStruct((N, C_out, HW), out_dtype),
        grid_spec=pltpu.PrefetchScalarGridSpec(
            num_scalar_prefetch=0,
            grid=grid,
            in_specs=[
                # co is the innermost grid axis and x's index map ignores it,
                # so the x block stays resident across C_out tiles (no re-DMA).
                pl.BlockSpec((Bn, C, tile_cols), lambda nb, j, co: (nb, 0, j)),
                pl.BlockSpec((tile_cout, C), lambda nb, j, co: (co, 0)),
            ],
            out_specs=pl.BlockSpec((Bn, tile_cout, tile_cols),
                                   lambda nb, j, co: (nb, co, j)),
        ),
        compiler_params=pltpu.CompilerParams(
            dimension_semantics=("parallel", "parallel", "parallel"),
            vmem_limit_bytes=vmem_limit),
        cost_estimate=cost,
    )(x_rows, w_eff)

    return out_rows.reshape(N, C_out, H, W)                # pure view, no data movement


def _reference(x_nchw, w_module, w_downsample=None):
    # Pure-JAX reference with the original (unfused) math.
    xf = x_nchw.astype(jnp.float32)
    out = jnp.einsum('oi,nihw->nohw', w_module.astype(jnp.float32), xf)
    if w_downsample is not None:
        identity = jnp.einsum('oi,nihw->nohw', w_downsample.astype(jnp.float32), xf)
    else:
        identity = xf
    return jnp.maximum(out + identity, 0.0).astype(x_nchw.dtype)


if __name__ == "__main__":
    key = jax.random.PRNGKey(0)
    k_x, k_wm, k_wd, k_wm2 = jax.random.split(key, 4)

    N, C_in, H, W = 2, 4, 16, 16
    C_out = 8

    x = jax.random.normal(k_x, (N, C_in, H, W), dtype=jnp.float32)
    # Deterministic 1x1-conv params, PyTorch layout (C_out, C_in), bias-free.
    # TODO(synk): a generic nn.Module `module`/`downsample` has no single Pallas
    # equivalent; this script instantiates them as bias-free 1x1 convs.
    w_module = jax.random.normal(k_wm, (C_out, C_in), dtype=jnp.float32) * 0.1
    w_down = jax.random.normal(k_wd, (C_out, C_in), dtype=jnp.float32) * 0.1
    w_module_sq = jax.random.normal(k_wm2, (C_in, C_in), dtype=jnp.float32) * 0.1

    # Path 1: downsample is not None (both matmuls folded into one weight).
    y_ds = jax.block_until_ready(residual_forward(x, w_module, w_down))
    y_ds_ref = _reference(x, w_module, w_down)

    # Path 2: downsample is None (identity skip folded as W + I).
    y_id = jax.block_until_ready(residual_forward(x, w_module_sq, None))
    y_id_ref = _reference(x, w_module_sq, None)

    assert y_ds.shape == (N, C_out, H, W)
    assert y_id.shape == (N, C_in, H, W)
    # Tolerances cover (a) the x@(Wm+Wd) / x@(Wm+I) rounding-order changes and
    # (b) TPU default matmul precision inside vs. outside the kernel.
    assert jnp.allclose(y_ds, y_ds_ref, atol=5e-3, rtol=1e-2)
    assert jnp.allclose(y_id, y_id_ref, atol=5e-3, rtol=1e-2)

    print("KERNEL_OK")
</pallas_src>

<mosaic_0001>
module attributes {stable_mosaic.version = 11 : i64} {
  func.func @_fused_residual_kernel(%arg0: i32, %arg1: i32, %arg2: i32, %arg3: memref<1x4x256xf32, #tpu.memory_space<vmem>>, %arg4: memref<8x4xf32, #tpu.memory_space<vmem>>, %arg5: memref<1x8x256xf32, #tpu.memory_space<vmem>>) attributes {dimension_semantics = [#tpu.dimension_semantics<parallel>, #tpu.dimension_semantics<parallel>, #tpu.dimension_semantics<parallel>], iteration_bounds = array<i64: 2, 1, 1>, scalar_prefetch = 0 : i64, scratch_operands = 0 : i64, tpu.core_type = #tpu.core_type<tc>, window_params = [{transform_indices = @transform_0, window_bounds = array<i64: 1, 4, 256>}, {transform_indices = @transform_1, window_bounds = array<i64: 8, 4>}, {transform_indices = @transform_2, window_bounds = array<i64: 1, 8, 256>}]} {
    %c0 = arith.constant 0 : index
    %c0_0 = arith.constant 0 : index
    %0 = vector.load %arg4[%c0, %c0_0] : memref<8x4xf32, #tpu.memory_space<vmem>>, vector<8x4xf32>
    %c0_1 = arith.constant 0 : index
    %c0_2 = arith.constant 0 : index
    %c0_3 = arith.constant 0 : index
    %1 = vector.load %arg3[%c0_1, %c0_2, %c0_3] : memref<1x4x256xf32, #tpu.memory_space<vmem>>, vector<1x4x256xf32>
    %2 = vector.shape_cast %1 : vector<1x4x256xf32> to vector<4x256xf32>
    %cst = arith.constant dense<0.000000e+00> : vector<8x256xf32>
    %3 = tpu.matmul %0, %2, %cst {dimension_numbers = #tpu.dot_dimension_numbers<[1], [0], [0], [1], [0, 0, 1, 1], [], []>} : vector<8x4xf32>, vector<4x256xf32>, vector<8x256xf32> -> vector<8x256xf32>
    %cst_4 = arith.constant 0.000000e+00 : f32
    %4 = vector.broadcast %cst_4 : f32 to vector<8x256xf32>
    %5 = arith.maximumf %3, %4 : vector<8x256xf32>
    %c0_5 = arith.constant 0 : index
    %c0_6 = arith.constant 0 : index
    %c0_7 = arith.constant 0 : index
    %6 = vector.load %arg5[%c0_5, %c0_6, %c0_7] : memref<1x8x256xf32, #tpu.memory_space<vmem>>, vector<1x8x256xf32>
    %7 = vector.shape_cast %6 : vector<1x8x256xf32> to vector<8x256xf32>
    %8 = vector.shape_cast %5 : vector<8x256xf32> to vector<1x8x256xf32>
    tpu.vector_store %arg5[%c0_5, %c0_6, %c0_7], %8 {strides = array<i32>} : memref<1x8x256xf32, #tpu.memory_space<vmem>>, vector<1x8x256xf32>,
    return
  }
  func.func @transform_0(%arg0: i32, %arg1: i32, %arg2: i32) -> (i32, i32, i32) {
    %c0_i32 = arith.constant 0 : i32
    %c0_i32_0 = arith.constant 0 : i32
    return %arg0, %c0_i32, %arg1 : i32, i32, i32
  }
  func.func @transform_1(%arg0: i32, %arg1: i32, %arg2: i32) -> (i32, i32) {
    %c0_i32 = arith.constant 0 : i32
    %c0_i32_0 = arith.constant 0 : i32
    return %arg2, %c0_i32 : i32, i32
  }
  func.func @transform_2(%arg0: i32, %arg1: i32, %arg2: i32) -> (i32, i32, i32) {
    %c0_i32 = arith.constant 0 : i32
    return %arg0, %arg2, %arg1 : i32, i32, i32
  }
}

</mosaic_0001>

<bundles_post_ra>
// kernel: tpu_custom_call.1
= control target key start
LH: loop header
LB: loop body
LE: loop exit
PB: predicated region body
PF: predicated region fallthrough
CT: control target
= control target key end

     0   :  { %7 = vsyncpa [#allocation3], 0  ;;  %s768_s0 = inlined_call_operand.hbm [shape: f32[2,4,256], index: 0, kind: input, shape index: {}]   ;;  %s769_s1 = inlined_call_operand.vmem [shape: f32[8,4], index: 1, kind: input, shape index: {}]   ;;  %s770_s2 = inlined_call_operand.hbm [shape: f32[2,8,256], index: 2, kind: output, shape index: {}]  }
   0x1   :  { %9 = vsyncpa [#allocation3 + $0x1], 0 }
   0x2   :  { %10 = vsyncpa [#allocation4], 0 }
   0x3   :  { %12 = vsyncpa [#allocation4 + $0x1], 0  ;;  %s630_s9 = smov 0   ;;  %s632_s10 = smov 0  }
   0x4   :  { %s634_s11 = smov 0   ;;  %s636_s12 = smov 0  }
   0x5   :  { %s638_s13 = smov 0   ;;  %s640_s14 = smov 0  }
   0x6 LB: > { %s417_s15 = sadd.s32 4294967295, %s610_s14   ;;  %s418_s16 = sadd.s32 4294967294, %s610_s14   ;;  %s610_s14 = sphi %s640_s14, %s18_s14   ;;  %s606_s13 = sphi %s638_s13, %s782_s13   ;;  %s602_s12 = sphi %s636_s12, %s781_s12   ;;  %s598_s11 = sphi %s634_s11, %s780_s11   ;;  %s594_s10 = sphi %s632_s10, %s779_s10   ;;  %s590_s9 = sphi %s630_s9, %s778_s9  }
   0x7   : > { %s37_s17 = sadd.s32 1, %s606_s13  ;;  %s46_s18 = sadd.s32 1, %s598_s11 }
   0x8   : > { %p39_p0 = scmp.ge.s32.totalorder %s37_s17, 2  ;;  %p53_p1 = scmp.ne.s32.totalorder %s598_s11, %s594_s10 }
   0x9   : > { %p54_p2 = scmp.eq.s32.totalorder %s610_s14, 0  ;;  %p59_p3 = scmp.ne.s32.totalorder %s594_s10, %s590_s9 }
   0xa   : > { %s784_s17 = smov (%p39_p0, %s37_s17), 0  ;;  %p60_p5 = scmp.eq.s32.totalorder %s417_s15, 0 }
   0xb   : > { %p671_p4 = por %p54_p2, %p53_p1  ;;  %s41_s20 = ssub.s32 %s606_s13, %s784_s17 }
   0xc   : > { %p113_p6 = scmp.eq.s32.totalorder %s417_s15, 1  ;;  %p44_p7 = scmp.eq.s32.totalorder %s41_s20, 0 }
   0xd   : > { %p677_p8 = por %p60_p5, %p59_p3  ;;  %p119_p10 = scmp.eq.s32.totalorder %s418_s16, 1 }
   0xe   : > { %p681_p9 = por %p113_p6, %p53_p1  ;;  %p450_p13 = scmp.lt.s32.totalorder %s610_s14, 2 }
   0xf   : > { %s686_s23 = scalar_select %p44_p7, %s598_s11, %s46_s18  }
  0x10   : > { %p688_p11 = por %p119_p10, %p59_p3  ;;  %s146_s25 = sand.u32 1, %s598_s11  }
  0x11   : > { %s422_s26 = sshll.u32 %s146_s25, 3  ;;  %s436_s27 = sshll.u32 %s606_s13, 7 }
  0x12   : > { %s774_s24 = scalar_select %p688_p11, 1, 0 }
  0x13   : > { %s158_s30 = scalar_lea.hbm %s768_s0, %s436_s27  ;;  %s150_s3 = scalar_lea.vmem [#allocation2], %s422_s26 }
  0x14   : > { %s160_s4 = sshll.u32 %s150_s3, 4  ;;  %p701_p0 = pnand %p450_p13, %p671_p4  ;;  %s161_s4 = int_to_ptr.vmem [resolvable:$true] %s160_s4 }
  0x15   : > { %p425_p1 = scmp.ge.s32.totalorder %s610_s14, 1  ;;  %p165_p2 = scmp.lt.s32.totalorder %s610_s14, 3 }
  0x16   : > { %s147_s6 = scalar_lea.sflag [#allocation3], %s146_s25  ;;  %p504_p3 = pneg %p701_p0 }
  0x17   : > { %s515_s7 = scalar_lea.vmem %s161_s4, 128  ;;  %s612_s8 = smov [#allocation2]  }
  0x18   : > { %p516_p5 = scmp.ne.s32.totalorder %s161_s4, %s515_s7  ;;  %s520_s15 = sshll.u32 %s612_s8, 4  ;;  %s521_s15 = int_to_ptr.vmem [resolvable:$false] %s520_s15 }
  0x19   : > { %s522_s16 = scalar_lea.vmem %s521_s15, 256  ;;  %p523_p10 = scmp.lt.s32.totalorder %s161_s4, %s521_s15 }
  0x1a   : > { %p518_p6 = pnand %p516_p5, %p504_p3  ;;  %p524_p12 = scmp.lt.s32.totalorder %s522_s16, %s515_s7 }
  0x1c   : > { %p519_p7 = pneg %p518_p6  ;;  %p525_p4 = por %p524_p12, %p523_p10 }
  0x1e   : > { %p526_p13 = pnand %p525_p4, %p519_p7 }
  0x20   : > { %529 = shalt.err (!%p526_p13)
}
  0x21   : > { %445 = dma.hbm_to_vmem [thread:$0]  (!%p701_p0), %s158_s30, 128, %s161_s4, %s147_s6  }
  0x22   : > { %p166_p11 = pnand %p425_p1, %p165_p2 }
  0x23   : > { %s716_s18 = sand.u32 (!%p166_p11), 1, %s594_s10  }
  0x24   : > { %169 = sbr.rel (%p166_p11) target bundleno = 257 (0x101), region = 28  ;;  %s426_s19 = sshll.u32 (!%p166_p11), %s716_s18, 3 }
  0x25   : > { %s172_s20 = scalar_lea.sflag (!%p166_p11), [#allocation3], %s716_s18  ;;  %s175_s25 = scalar_lea.vmem (!%p166_p11), [#allocation2], %s426_s19 }
  0x29   : > { %581 = dma.done.wait (%p677_p8), %s172_s20, 128  }
  0x2a   : > { %583 = vsyncadd (%p677_p8), %s172_s20, 4294967168  ;;  %v613_v0 = vmov 0.0   ;;  %v207_v1 = vld [vmem:[%s175_s25] sm:$0xff]  ;;  %vm214_vm0 = vcmask 1043456   ;;  %vm210_vm1 = vcmask 31744   ;;  %s427_s28 = sshll.u32 %s716_s18, 4 }
  0x2b   : > { %283 = vmatprep.mubr.f32.mxu0 %v613_v0  ;;  %v209_v2 = vcombine.high %v207_v1, %v207_v1  ;;  %v206_v3 = vld [vmem:[%s769_s1] sm:$0xff]  ;;  %s437_s21 = sshll.u32 %s602_s12, 8  ;;  %s199_s29 = scalar_lea.vmem [#allocation5], %s427_s28 }
  0x2c   : > { %s313_s30 = sshll.u32 %s199_s29, 4  ;;  %s311_s5 = scalar_lea.hbm %s770_s2, %s437_s21  ;;  %s314_s30 = int_to_ptr.vmem [resolvable:$true] %s313_s30 }
  0x2d   : > { %428 = vmatprep.subr.msk.mxu0 %vm214_vm0, %v209_v2  ;;  %s295_s6 = scalar_lea.sflag [#allocation4], %s716_s18  ;;  %s530_s7 = scalar_lea.vmem %s314_s30, 256 }
  0x2e   : > { %429 = vmatpush1.msk.msra.mxu0 %vm214_vm0, %v207_v1  ;;  %p531_p8 = scmp.ne.s32.totalorder %s314_s30, %s530_s7  ;;  %s614_s8 = smov [#allocation5]  }
  0x2f   : > { %430 = vmatmul.mubr.msk.f32.vlgmr.msra.gmra.mxu0 %vm210_vm1, %v206_v3  ;;  %s534_s12 = sshll.u32 %s614_s8, 4  ;;  %s535_s12 = int_to_ptr.vmem [resolvable:$false] %s534_s12 }
  0x30   : > { %p532_p11 = pnand %p531_p8, %p681_p9  ;;  %s536_s15 = scalar_lea.vmem %s535_s12, 512 }
  0x31   : > { %p537_p0 = scmp.lt.s32.totalorder %s314_s30, %s535_s12  ;;  %p538_p1 = scmp.lt.s32.totalorder %s536_s15, %s530_s7 }
  0x32   : > { %p533_p12 = pneg %p532_p11 }
  0x33   : > { %p539_p2 = por %p538_p1, %p537_p0 }
  0x35   : > { %p540_p3 = pnand %p539_p2, %p533_p12 }
  0xef   : > { %v285_v4 = vpop.f32.mrf.mxu0 }
  0xf0   : > { %v290_v5 = vmax.f32 %v285_v4, 0.0 }
  0xf1   : > { %v287_v6 = vpop.f32.mrf.mxu0 }
  0xf2   : > { %292 = vst [vmem:[%s199_s29] sm:$0xff] %v290_v5  ;;  %v291_v7 = vmax.f32 %v287_v6, 0.0 }
  0xf4   : > { %293 = vst [vmem:[%s199_s29 + $0x8] sm:$0xff] %v291_v7 }
  0xf5   : > { %543 = shalt.err (!%p540_p3)
}
  0xf6   : > { %s544_s16 = scalar_lea.hbm %s311_s5, 256  ;;  %s548_s20 = scalar_lea.hbm %s770_s2, 512 }
  0xf7   : > { %p545_p5 = scmp.ne.s32.totalorder %s311_s5, %s544_s16  ;;  %p549_p10 = scmp.lt.s32.totalorder %s311_s5, %s770_s2 }
  0xf8   : > { %p550_p4 = scmp.lt.s32.totalorder %s548_s20, %s544_s16 }
  0xf9   : > { %p546_p6 = pnand %p545_p5, %p681_p9 }
  0xfa   : > { %p551_p13 = por %p550_p4, %p549_p10 }
  0xfb   : > { %p547_p7 = pneg %p546_p6 }
  0xfd   : > { %p552_p8 = pnand %p551_p13, %p547_p7 }
  0xff   : > { %555 = shalt.err (!%p552_p8)
}
 0x100   : > { %440 = dma.vmem_to_hbm [thread:$0]  (%p681_p9), %s314_s30, 256, %s311_s5, %s295_s6  }
 0x101 PF: > { %s325_s27 = sand.u32 1, %s590_s9   ;;  %p776_p11 = scmp.ne.s32.totalorder %s774_s24, 0 }
 0x102   : > { %p777_p12 = scmp.ge.s32.totalorder %s610_s14, 2  ;;  %s326_s28 = scalar_lea.sflag [#allocation4], %s325_s27 }
 0x104   : > { %p447_p0 = pnand %p777_p12, %p776_p11 }
 0x106   : > { %p448_p1 = pneg %p447_p0 }
 0x108   : > { %585 = dma.done.wait (%p448_p1), %s326_s28, 256  }
 0x109   : > { %587 = vsyncadd (%p448_p1), %s326_s28, 4294967040  ;;  %s18_s14 = sadd.s32 1, %s610_s14   ;;  %s778_s9 = smov %s594_s10 }
 0x10a   : > { %p15_p2 = scmp.ge.s32.totalorder %s18_s14, 4   ;;  %s779_s10 = smov %s598_s11 }
 0x10b   : > { %s780_s11 = smov %s686_s23  ;;  %s781_s12 = smov %s606_s13 }
 0x10c   : > { %s782_s13 = smov %s784_s17  ;;  %17 = sbr.rel (!%p15_p2) target bundleno = 6 (0x6), region = 76 }
 0x111   :  { %331 = vsyncpa [#allocation3], 1 }
 0x112   :  { %333 = vsyncpa [#allocation3 + $0x1], 1 }
 0x113   :  { %334 = vsyncpa [#allocation4], 1 }
 0x114   :  { %336 = vsyncpa [#allocation4 + $0x1], 1 }

</bundles_post_ra>
